<compile_context>
chip_gen: v7x
topology: tpu7x:2x2x1
jax: 0.10.0
libtpu: 0.0.40
codegen_flags: <defaults>
</compile_context>

<pallas_src>
import jax
import jax.numpy as jnp
from jax.experimental import pallas as pl
from jax.experimental.pallas import tpu as pltpu


# ---------------------------------------------------------------------------
# Primary kernel: aliased no-op (zero HBM traffic).
# ---------------------------------------------------------------------------
def _identity_noop_kernel(x_ref, o_ref):
    # y = x and o_ref aliases x_ref's HBM buffer -> nothing to move/compute.
    # touch() registers a read+write effect so the aliased output counts as
    # produced by this kernel and the call is not dead-code eliminated.
    del x_ref
    pltpu.touch(o_ref)


def _identity_noop(x):
    return pl.pallas_call(
        _identity_noop_kernel,
        out_shape=jax.ShapeDtypeStruct(x.shape, x.dtype),
        in_specs=[pl.BlockSpec(memory_space=pl.ANY)],
        out_specs=pl.BlockSpec(memory_space=pl.ANY),
        input_output_aliases={0: 0},  # donate the input HBM buffer as output
        compiler_params=pltpu.CompilerParams(has_side_effects=True),
    )(x)


# ---------------------------------------------------------------------------
# Fallback kernel: one whole-array HBM->HBM DMA (no VMEM staging, no grid).
# ---------------------------------------------------------------------------
def _identity_dma_kernel(x_hbm, o_hbm, sem):
    cp = pltpu.make_async_copy(x_hbm, o_hbm, sem)
    cp.start()
    cp.wait()


def _identity_dma(x):
    nbytes = x.size * jnp.dtype(x.dtype).itemsize
    return pl.pallas_call(
        _identity_dma_kernel,
        out_shape=jax.ShapeDtypeStruct(x.shape, x.dtype),
        in_specs=[pl.BlockSpec(memory_space=pl.ANY)],
        out_specs=pl.BlockSpec(memory_space=pl.ANY),
        scratch_shapes=[pltpu.SemaphoreType.DMA(())],
        cost_estimate=pl.CostEstimate(
            flops=0, transcendentals=0, bytes_accessed=2 * nbytes),
    )(x)


_ZERO_COPY_OK = None  # None = untried, True/False after the first attempt


def linear_activation(x):
    """Forward pass of LinearActivation: y = x, executed via a Pallas TPU kernel."""
    global _ZERO_COPY_OK
    if x.size == 0:
        return x
    if _ZERO_COPY_OK is not False:
        try:
            y = _identity_noop(x)
            if _ZERO_COPY_OK is None:
                jax.block_until_ready(y)  # surface first-call failures here
            _ZERO_COPY_OK = True
            return y
        except Exception:
            # Toolchain could not lower the aliased no-op; degrade to a single
            # HBM->HBM DMA copy (still no VMEM staging / grid overhead).
            _ZERO_COPY_OK = False
    return _identity_dma(x)


if __name__ == "__main__":
    key = jax.random.PRNGKey(0)

    # NCHW input consistent with the module's typical use.
    x = jax.random.normal(key, (2, 4, 16, 16), dtype=jnp.float32)
    y = linear_activation(x)
    jax.block_until_ready(y)
    assert y.shape == x.shape and y.dtype == x.dtype
    assert bool(jnp.array_equal(y, x))

    # Awkward shape (element count not a multiple of 128) -- no special-case
    # tiling is needed on either path.
    x_odd = jax.random.normal(key, (2, 3, 5, 7), dtype=jnp.float32)
    y_odd = linear_activation(x_odd)
    jax.block_until_ready(y_odd)
    assert bool(jnp.array_equal(y_odd, x_odd))

    # bf16 slab to exercise dtype/size independence of the zero-copy path.
    x_big = jax.random.normal(key, (8, 128, 256), dtype=jnp.bfloat16)
    y_big = linear_activation(x_big)
    jax.block_until_ready(y_big)
    assert bool(jnp.array_equal(y_big, x_big))

    print("KERNEL_OK")
</pallas_src>

<mosaic_0001>
module attributes {stable_mosaic.version = 11 : i64} {
  func.func @_identity_noop_kernel(%arg0: memref<2x4x16x16xf32, #tpu.memory_space<any>>, %arg1: memref<2x4x16x16xf32, #tpu.memory_space<any>>) attributes {dimension_semantics = [], scalar_prefetch = 0 : i64, scratch_operands = 0 : i64, tpu.core_type = #tpu.core_type<tc>} {
    return
  }
}

module attributes {stable_mosaic.version = 11 : i64} {
  func.func @_identity_dma_kernel(%arg0: memref<2x4x16x16xf32, #tpu.memory_space<any>>, %arg1: memref<2x4x16x16xf32, #tpu.memory_space<any>>, %arg2: memref<!tpu.dma_semaphore, #tpu.memory_space<semaphore_mem>>) attributes {dimension_semantics = [], scalar_prefetch = 0 : i64, scratch_operands = 1 : i64, tpu.core_type = #tpu.core_type<tc>} {
    tpu.enqueue_dma source(%arg0 : memref<2x4x16x16xf32, #tpu.memory_space<any>>) target(%arg1 : memref<2x4x16x16xf32, #tpu.memory_space<any>>) target_semaphore(%arg2 : memref<!tpu.dma_semaphore, #tpu.memory_space<semaphore_mem>>)
    tpu.wait_dma2 semaphore(%arg2 : memref<!tpu.dma_semaphore, #tpu.memory_space<semaphore_mem>>) src(%arg0 : memref<2x4x16x16xf32, #tpu.memory_space<any>>) dst(%arg1 : memref<2x4x16x16xf32, #tpu.memory_space<any>>)
    return
  }
}

</mosaic_0001>

<bundles_post_ra>
// kernel: tpu_custom_call.1
= control target key start
LH: loop header
LB: loop body
LE: loop exit
PB: predicated region body
PF: predicated region fallthrough
CT: control target
= control target key end

     0   :  { %s16_s0 = inlined_call_operand.hbm [shape: f32[2,4,16,16], index: 0, kind: input, shape index: {}, may-alias: {0,1}]   ;;  %s17_s1 = inlined_call_operand.hbm [shape: f32[2,4,16,16], index: 1, kind: output, shape index: {}, may-alias: {0,1}]  }

// kernel: tpu_custom_call.1
= control target key start
LH: loop header
LB: loop body
LE: loop exit
PB: predicated region body
PF: predicated region fallthrough
CT: control target
= control target key end

     0   :  { %s36_s6 = smov [#allocation2]   ;;  %s37_s7 = smov [#allocation3]   ;;  %s55_s0 = inlined_call_operand.hbm [shape: f32[2,4,16,16], index: 0, kind: input, shape index: {}]   ;;  %s56_s1 = inlined_call_operand.hbm [shape: f32[2,4,16,16], index: 1, kind: output, shape index: {}]  }
   0x1   :  { %s38_s8 = smov 0  }
   0x2   :  { %18 = dma.general %s55_s0, 2048, %s56_s1, %s36_s6, %s37_s7, [#allocation4], %s38_s8, 0  }
   0x3   :  { %34 = dma.done.wait [#allocation2], 2048 }
   0x4   :  { %35 = vsyncadd [#allocation2], 4294965248 }
   0x5   :  { %24 = vsyncmov [#allocation2] }
   0x8   :  { %s25_s13 = vpop.sfrf %24 }
   0x9   :  { %p30_p0 = scmp.ne.s32.totalorder %s25_s13, 0 }
   0xb   :  { %29 = shalt.err (%p30_p0)  }

</bundles_post_ra>
